<compile_context>
chip_gen: v7x
topology: tpu7x:2x2x1
jax: 0.10.0
libtpu: 0.0.40
codegen_flags: <defaults>
</compile_context>

<pallas_src>
import functools

import jax
import jax.numpy as jnp
from jax.experimental import pallas as pl
from jax.experimental.pallas import tpu as pltpu

LANE = 128


def _round_up(x, m):
    return ((x + m - 1) // m) * m


def _vmem_capacity_bytes():
    try:
        return int(pltpu.get_tpu_info().vmem_capacity_bytes)
    except Exception:
        return 64 << 20  # conservative fallback (v7x per-core VMEM)


# ---------------------------------------------------------------------------
# Path A: im2col (wrapper) + lane-dense GEMM-with-bias kernel.
# ---------------------------------------------------------------------------
def _gemm_bias_kernel(p_ref, w_ref, b_ref, o_ref):
    # p_ref: (TM, Kc)  lane-dense im2col rows (full K*K*Cin contraction)
    # w_ref: (Kc, TN)  weights
    # b_ref: (1, TN)   f32 bias
    # o_ref: (TM, TN)
    acc = jnp.dot(p_ref[...], w_ref[...], preferred_element_type=jnp.float32)
    o_ref[...] = (acc + b_ref[...].astype(jnp.float32)).astype(o_ref.dtype)


def _conv_via_im2col_gemm(xp, weight_oihw, bias2d, out_dtype, *,
                          N, Ho, Wo, Cin, Cout, Cout_p, K, stride, vmem_limit):
    cdt = xp.dtype
    isz = jnp.dtype(cdt).itemsize
    Kc = K * K * Cin

    # Wrapper-side im2col: tap order (kh, kw, cin) matches the weight reshape.
    # Strided slicing (stride > 1) is done here by XLA, so the kernel never
    # needs strided sublane slices.
    cols = []
    for kh in range(K):
        for kw in range(K):
            cols.append(xp[:, kh:kh + (Ho - 1) * stride + 1:stride,
                           kw:kw + (Wo - 1) * stride + 1:stride, :])
    patches = jnp.concatenate(cols, axis=-1)                # (N, Ho, Wo, Kc)
    M = N * Ho * Wo
    patches = patches.reshape(M, Kc)

    # Row-tile size: keep the LHS block a few MiB.
    TM = max(8, min(512, ((4 << 20) // max(Kc * isz, 1)) // 8 * 8))
    TM = min(TM, _round_up(M, 8))
    M_pad = _round_up(M, TM)
    if M_pad > M:
        patches = jnp.pad(patches, ((0, M_pad - M), (0, 0)))

    # OIHW -> (K*K*Cin, Cout_p), taps ordered (kh, kw, cin); lane-dense Cout.
    w = jnp.transpose(weight_oihw, (2, 3, 1, 0)).reshape(Kc, Cout)
    w = jnp.pad(w, ((0, 0), (0, Cout_p - Cout))).astype(cdt)

    TN = LANE
    grid = (M_pad // TM, Cout_p // TN)
    out2d = pl.pallas_call(
        _gemm_bias_kernel,
        out_shape=jax.ShapeDtypeStruct((M_pad, Cout_p), out_dtype),
        grid=grid,
        in_specs=[
            pl.BlockSpec((TM, Kc), lambda m, n: (m, 0)),
            pl.BlockSpec((Kc, TN), lambda m, n: (0, n)),
            pl.BlockSpec((1, TN), lambda m, n: (0, n)),
        ],
        out_specs=pl.BlockSpec((TM, TN), lambda m, n: (m, n)),
        compiler_params=pltpu.CompilerParams(
            dimension_semantics=("parallel", "parallel"),
            vmem_limit_bytes=vmem_limit),
    )(patches, w, bias2d)

    out = out2d[:M, :Cout].reshape(N, Ho, Wo, Cout)
    return jnp.transpose(out, (0, 3, 1, 2))                 # NCHW


# ---------------------------------------------------------------------------
# Path B: stride-1 deep layers, manual halo DMA + kh-grouped MXU dots.
# ---------------------------------------------------------------------------
def _conv_rows_kernel(x_hbm, w_ref, b_ref, o_ref, xbuf, sem, *,
                      K, TH, TH_in, Wo, Cin, Cout_p, tiles_per_part):
    # x_hbm : (N, Hp_pad, Wp, Cin)   padded input, resident in HBM (pl.ANY)
    # w_ref : (K, K*Cin, Cout_p)     kh-grouped weights (kw, cin) flattened
    # b_ref : (1, Cout_p)            f32 bias
    # o_ref : (TH, Wo, Cout_p)       one row tile of one image
    # xbuf  : (2, TH_in, Wp, Cin)    double-buffered halo slab (VMEM scratch)
    # sem   : DMA semaphores, one per slot
    n = pl.program_id(0)          # batch index
    p = pl.program_id(1)          # row-tile partition (feeds 2 TCs on v7x)
    j = pl.program_id(2)          # row tile within the partition (sequential)
    tile = p * tiles_per_part + j
    slot = j & 1

    def copy_in(tile_idx, dst_slot):
        return pltpu.make_async_copy(
            x_hbm.at[n, pl.ds(tile_idx * TH, TH_in)],
            xbuf.at[dst_slot],
            sem.at[dst_slot])

    # Prologue: prime slot 0 for this (image, partition) column.
    # TODO(synk): prefetch tile 0 of the next column on the last step to hide
    # the per-column prologue DMA (needs a cross-column grid-order guarantee).
    @pl.when(j == 0)
    def _():
        copy_in(tile, 0).start()

    # Wait for the current tile, then prefetch the next tile into the other slot.
    copy_in(tile, slot).wait()

    @pl.when(j + 1 < tiles_per_part)
    def _():
        copy_in(tile + 1, 1 - slot).start()

    # Bias-initialized f32 accumulator.  K kh-grouped dots with contraction
    # K*Cin (e.g. 384 for Cin=128) instead of K*K per-tap dots of depth Cin:
    # better MXU fill and only K accumulate passes.
    # TODO(synk): tile the M (=TH*Wo) dimension in-kernel to keep each
    # accumulator chunk closer to the vreg file.
    acc = jnp.broadcast_to(b_ref[...].astype(jnp.float32), (TH * Wo, Cout_p))
    for kh in range(K):
        rows = xbuf[slot, pl.ds(kh, TH), :, :]                    # (TH, Wp, Cin)
        lhs = jnp.concatenate([rows[:, kw:kw + Wo, :] for kw in range(K)],
                              axis=-1)                            # (TH, Wo, K*Cin)
        lhs = lhs.reshape(TH * Wo, K * Cin)
        acc = acc + jnp.dot(lhs, w_ref[kh],
                            preferred_element_type=jnp.float32)
    o_ref[...] = acc.reshape(TH, Wo, Cout_p).astype(o_ref.dtype)


def _pick_tile_h(Ho, Wo, Wp, Cin, Cout_p, K, in_isz, out_isz, budget):
    """Largest row tile whose estimated VMEM footprint fits `budget` bytes."""
    sub_in = max(8, 32 // max(in_isz, 1))
    sub_out = max(8, 32 // max(out_isz, 1))

    def need(th):
        th_in = th + K - 1
        slab = th_in * _round_up(Wp, sub_in) * _round_up(Cin, LANE) * in_isz
        outb = th * _round_up(Wo, sub_out) * Cout_p * out_isz
        acc = th * Wo * Cout_p * 4
        lhs = th * _round_up(Wo, sub_in) * _round_up(K * Cin, LANE) * in_isz
        w = K * K * Cin * Cout_p * in_isz + Cout_p * 4
        return 2 * slab + 2 * outb + acc + 2 * lhs + 2 * w

    th = min(_round_up(max(Ho, 1), 8), 128)
    while th > 8 and need(th) > budget:
        th -= 8
    return max(1, th)


def _conv_rows(xp, weight_oihw, bias2d, out_dtype, *,
               N, Hp, Wp, Ho, Wo, Cin, Cout, Cout_p, K, vmem_limit, tile_h):
    cdt = xp.dtype
    in_isz = jnp.dtype(cdt).itemsize
    out_isz = jnp.dtype(out_dtype).itemsize

    if tile_h is None:
        TH = _pick_tile_h(Ho, Wo, Wp, Cin, Cout_p, K, in_isz, out_isz,
                          budget=int(vmem_limit * 0.8))
    else:
        TH = max(1, int(tile_h))

    n_tiles = pl.cdiv(Ho, TH)
    n_parts = 2 if n_tiles >= 4 else 1   # feed both v7x TensorCores at batch 1
    tiles_per_part = pl.cdiv(n_tiles, n_parts)
    Ho_pad = n_parts * tiles_per_part * TH
    TH_in = TH + K - 1                   # stride == 1 on this path
    Hp_need = Ho_pad + K - 1
    if Hp_need > Hp:
        xp = jnp.pad(xp, ((0, 0), (0, Hp_need - Hp), (0, 0), (0, 0)))

    # kh-grouped weights: w[kh, kw*Cin + c, co] = weight[co, c, kh, kw].
    # TODO(synk): for Cin << 128 layers repack the halo slab lane-dense instead
    # of leaving Cin on the (mostly empty) lane axis.
    w = jnp.transpose(weight_oihw, (2, 3, 1, 0)).reshape(K, K * Cin, Cout)
    w = jnp.pad(w, ((0, 0), (0, 0), (0, Cout_p - Cout))).astype(cdt)

    kernel = functools.partial(
        _conv_rows_kernel, K=K, TH=TH, TH_in=TH_in, Wo=Wo,
        Cin=Cin, Cout_p=Cout_p, tiles_per_part=tiles_per_part)

    # TODO(synk): mark w / bias single-buffered (pipeline_mode=pl.Buffered(1))
    # once validated; constant index maps don't need double buffering.
    out = pl.pallas_call(
        kernel,
        out_shape=jax.ShapeDtypeStruct((N, Ho_pad, Wo, Cout_p), out_dtype),
        grid_spec=pltpu.PrefetchScalarGridSpec(
            num_scalar_prefetch=0,
            grid=(N, n_parts, tiles_per_part),
            in_specs=[
                pl.BlockSpec(memory_space=pl.ANY),            # input stays in HBM
                pl.BlockSpec((K, K * Cin, Cout_p), lambda n, p, j: (0, 0, 0)),
                pl.BlockSpec((1, Cout_p), lambda n, p, j: (0, 0)),
            ],
            out_specs=pl.BlockSpec(
                (None, TH, Wo, Cout_p),
                lambda n, p, j: (n, p * tiles_per_part + j, 0, 0)),
            scratch_shapes=[
                pltpu.VMEM((2, TH_in, Wp, Cin), cdt),         # halo double-buffer
                pltpu.SemaphoreType.DMA((2,)),
            ],
        ),
        compiler_params=pltpu.CompilerParams(
            dimension_semantics=("parallel", "parallel", "arbitrary"),
            vmem_limit_bytes=vmem_limit),
    )(xp, w, bias2d)

    out = out[:, :Ho, :, :Cout]
    return jnp.transpose(out, (0, 3, 1, 2))                   # NCHW


# ---------------------------------------------------------------------------
# Public wrapper: ConvLayer.forward for NCHW input.
# ---------------------------------------------------------------------------
def conv_layer_forward(x_nchw, weight_oihw, bias, *, stride,
                       compute_dtype=None, tile_h=None):
    """ReflectionPad2d(K//2) + Conv2d(stride).  `compute_dtype=jnp.bfloat16`
    enables the bf16 MXU fast path (f32 accumulation is kept)."""
    N, Cin, H, W = x_nchw.shape
    Cout, Cin_w, K, K2 = weight_oihw.shape
    assert Cin_w == Cin and K2 == K
    pad = K // 2
    out_dtype = x_nchw.dtype
    cdt = jnp.dtype(compute_dtype) if compute_dtype is not None else jnp.dtype(out_dtype)

    cap = _vmem_capacity_bytes()
    vmem_limit = min(cap * 3 // 4, 112 << 20)   # generation-adaptive VMEM budget

    # --- glue: reflection pad + NCHW -> NHWC (XLA) --------------------------
    # TODO(synk): keep activations NHWC / channel-padded between layers and fold
    # the row reflection into the halo DMA to remove these HBM round-trips.
    xp = jnp.pad(x_nchw, ((0, 0), (0, 0), (pad, pad), (pad, pad)), mode="reflect")
    xp = jnp.transpose(xp, (0, 2, 3, 1)).astype(cdt)          # (N, Hp, Wp, Cin)
    Hp, Wp = H + 2 * pad, W + 2 * pad
    Ho = (Hp - K) // stride + 1
    Wo = (Wp - K) // stride + 1

    Cout_p = _round_up(Cout, LANE)                            # lane-dense output
    bias2d = jnp.pad(bias.astype(jnp.float32).reshape(1, Cout),
                     ((0, 0), (0, Cout_p - Cout)))

    # Route: strided convs and tiny receptive fields (incl. the K=9/Cin=3 first
    # layer) go through wrapper-side im2col + GEMM; deep stride-1 layers use
    # the row-tiled halo-DMA kernel.
    if stride > 1 or K * K * Cin <= 512:
        return _conv_via_im2col_gemm(
            xp, weight_oihw, bias2d, out_dtype,
            N=N, Ho=Ho, Wo=Wo, Cin=Cin, Cout=Cout, Cout_p=Cout_p,
            K=K, stride=stride, vmem_limit=vmem_limit)
    return _conv_rows(
        xp, weight_oihw, bias2d, out_dtype,
        N=N, Hp=Hp, Wp=Wp, Ho=Ho, Wo=Wo, Cin=Cin, Cout=Cout, Cout_p=Cout_p,
        K=K, vmem_limit=vmem_limit, tile_h=tile_h)


# ---------------------------------------------------------------------------
# Reference + self-test
# ---------------------------------------------------------------------------
def _reference(x, weight, bias, stride, compute_dtype=None):
    pad = weight.shape[2] // 2
    if compute_dtype is not None:
        x = x.astype(compute_dtype)
        weight = weight.astype(compute_dtype)
    xp = jnp.pad(x, ((0, 0), (0, 0), (pad, pad), (pad, pad)), mode="reflect")
    out = jax.lax.conv_general_dilated(
        xp, weight, window_strides=(stride, stride), padding="VALID",
        dimension_numbers=("NCHW", "OIHW", "NCHW"),
        preferred_element_type=jnp.float32)
    return out + bias.reshape(1, -1, 1, 1).astype(jnp.float32)


if __name__ == "__main__":
    key = jax.random.PRNGKey(0)

    configs = [
        # (N, Cin, H, W, Cout, K, stride, tile_h, compute_dtype, atol)
        (2, 4, 16, 16, 8, 3, 1, None, None, 2e-4),            # GEMM path, tiny Cin
        (1, 3, 20, 20, 8, 9, 1, None, None, 2e-4),            # first-layer style K=9
        (1, 16, 17, 18, 8, 3, 2, None, None, 2e-4),           # stride-2 (im2col de-interleave)
        (1, 64, 36, 16, 32, 3, 1, 8, None, 2e-4),             # row-tiled, 2 partitions, padding
        (1, 128, 24, 24, 64, 3, 1, None, jnp.bfloat16, 3e-2), # row-tiled, bf16 MXU feed
    ]

    for idx, (N, Cin, H, W, Cout, K, stride, tile_h, cdt, atol) in enumerate(configs):
        key, kx, kw_, kb = jax.random.split(key, 4)
        x = jax.random.normal(kx, (N, Cin, H, W), dtype=jnp.float32)

        # PyTorch Conv2d default init: U(-bound, bound), bound = 1/sqrt(fan_in)
        fan_in = Cin * K * K
        bound = 1.0 / (fan_in ** 0.5)
        weight = jax.random.uniform(kw_, (Cout, Cin, K, K), jnp.float32, -bound, bound)
        bias = jax.random.uniform(kb, (Cout,), jnp.float32, -bound, bound)

        out = conv_layer_forward(x, weight, bias, stride=stride,
                                 compute_dtype=cdt, tile_h=tile_h)
        out = jax.block_until_ready(out)

        ref = _reference(x, weight, bias, stride, compute_dtype=cdt)
        assert out.shape == ref.shape, (idx, out.shape, ref.shape)
        err = float(jnp.max(jnp.abs(out.astype(jnp.float32) - ref)))
        assert err <= atol, (idx, err)

    print("KERNEL_OK")
</pallas_src>

<mosaic_0001>
module attributes {stable_mosaic.version = 11 : i64} {
  func.func @_gemm_bias_kernel(%arg0: i32, %arg1: i32, %arg2: memref<512x36xf32, #tpu.memory_space<vmem>>, %arg3: memref<36x128xf32, #tpu.memory_space<vmem>>, %arg4: memref<1x128xf32, #tpu.memory_space<vmem>>, %arg5: memref<512x128xf32, #tpu.memory_space<vmem>>) attributes {dimension_semantics = [#tpu.dimension_semantics<parallel>, #tpu.dimension_semantics<parallel>], iteration_bounds = array<i64: 1, 1>, scalar_prefetch = 0 : i64, scratch_operands = 0 : i64, tpu.core_type = #tpu.core_type<tc>, window_params = [{transform_indices = @transform_0, window_bounds = array<i64: 512, 36>}, {transform_indices = @transform_1, window_bounds = array<i64: 36, 128>}, {transform_indices = @transform_2, window_bounds = array<i64: 1, 128>}, {transform_indices = @transform_3, window_bounds = array<i64: 512, 128>}]} {
    %c0 = arith.constant 0 : index
    %c0_0 = arith.constant 0 : index
    %0 = vector.load %arg2[%c0, %c0_0] : memref<512x36xf32, #tpu.memory_space<vmem>>, vector<512x36xf32>
    %c0_1 = arith.constant 0 : index
    %c0_2 = arith.constant 0 : index
    %1 = vector.load %arg3[%c0_1, %c0_2] : memref<36x128xf32, #tpu.memory_space<vmem>>, vector<36x128xf32>
    %cst = arith.constant dense<0.000000e+00> : vector<512x128xf32>
    %2 = tpu.matmul %0, %1, %cst {dimension_numbers = #tpu.dot_dimension_numbers<[1], [0], [0], [1], [0, 0, 1, 1], [], []>} : vector<512x36xf32>, vector<36x128xf32>, vector<512x128xf32> -> vector<512x128xf32>
    %c0_3 = arith.constant 0 : index
    %c0_4 = arith.constant 0 : index
    %3 = vector.load %arg4[%c0_3, %c0_4] : memref<1x128xf32, #tpu.memory_space<vmem>>, vector<1x128xf32>
    %4 = vector.broadcast %3 : vector<1x128xf32> to vector<512x128xf32>
    %5 = arith.addf %2, %4 : vector<512x128xf32>
    %c0_5 = arith.constant 0 : index
    %c0_6 = arith.constant 0 : index
    %6 = vector.load %arg5[%c0_5, %c0_6] : memref<512x128xf32, #tpu.memory_space<vmem>>, vector<512x128xf32>
    tpu.vector_store %arg5[%c0_5, %c0_6], %5 {strides = array<i32>} : memref<512x128xf32, #tpu.memory_space<vmem>>, vector<512x128xf32>,
    return
  }
  func.func @transform_0(%arg0: i32, %arg1: i32) -> (i32, i32) {
    %c0_i32 = arith.constant 0 : i32
    %c0_i32_0 = arith.constant 0 : i32
    return %arg0, %c0_i32 : i32, i32
  }
  func.func @transform_1(%arg0: i32, %arg1: i32) -> (i32, i32) {
    %c0_i32 = arith.constant 0 : i32
    %c0_i32_0 = arith.constant 0 : i32
    return %c0_i32, %arg1 : i32, i32
  }
  func.func @transform_2(%arg0: i32, %arg1: i32) -> (i32, i32) {
    %c0_i32 = arith.constant 0 : i32
    %c0_i32_0 = arith.constant 0 : i32
    return %c0_i32, %arg1 : i32, i32
  }
  func.func @transform_3(%arg0: i32, %arg1: i32) -> (i32, i32) {
    %c0_i32 = arith.constant 0 : i32
    return %arg0, %arg1 : i32, i32
  }
}

</mosaic_0001>

<bundles_post_ra>
// kernel: tpu_custom_call.1
= control target key start
LH: loop header
LB: loop body
LE: loop exit
PB: predicated region body
PF: predicated region fallthrough
CT: control target
= control target key end

     0   :  { %vm91_vm0 = vcmask 293888   ;;  %vm284_vm1 = vcmask 1043456   ;;  %s1410_s0 = inlined_call_operand.vmem [shape: f32[512,36], index: 0, kind: input, shape index: {}]   ;;  %s1411_s1 = inlined_call_operand.vmem [shape: f32[36,128], index: 1, kind: input, shape index: {}]   ;;  %s1412_s2 = inlined_call_operand.vmem [shape: f32[1,128], index: 2, kind: input, shape index: {}]   ;;  %s1413_s3 = inlined_call_operand.hbm [shape: f32[512,128], index: 3, kind: output, shape index: {}]  }
   0x1   :  { %v79_v0 = vld [vmem:[%s1411_s1] sm:$0xff]  ;;  %v80_v1 = vld [vmem:[%s1411_s1 + $0x8] sm:$0xff]  ;;  %v81_v2 = vld [vmem:[%s1411_s1 + $0x10] sm:$0xff] }
   0x2   :  { %v994_v3 = vpack.c.bf16 %v80_v1, %v79_v0  ;;  %v82_v4 = vld [vmem:[%s1411_s1 + $0x18] sm:$0xff]  ;;  %v15_v5 = vld [vmem:[%s1410_s0] sm:$0xff]  ;;  %v16_v9 = vld [vmem:[%s1410_s0 + $0x8] sm:$0xff] }
   0x3   :  { %v998_v6 = vpack.c.bf16 %v82_v4, %v81_v2  ;;  %898 = vmatprep.mubr.msk.f32.mxu0 %vm91_vm0, %v15_v5  ;;  %v47_v7 = vld [vmem:[%s1410_s0 + $0x100] sm:$0xff]  ;;  %v48_v10 = vld [vmem:[%s1410_s0 + $0x108] sm:$0xff]  ;;  %v17_v11 = vld [vmem:[%s1410_s0 + $0x10] sm:$0xff] }
   0x4   :  { %995 = vmatprep.subr.bf16.mxu0 %v994_v3  ;;  %1002 = vmatprep.subr.bf16.mxu1 %v994_v3  ;;  %v83_v8 = vld [vmem:[%s1411_s1 + $0x20] sm:$0xf]  ;;  %v49_v12 = vld [vmem:[%s1410_s0 + $0x110] sm:$0xff]  ;;  %v18_v13 = vld [vmem:[%s1410_s0 + $0x18] sm:$0xff] }
   0x5   :  { %997 = vmatpush3.bf16.msra.mxu0 %v994_v3  ;;  %1005 = vmatpush3.bf16.msra.mxu1 %v994_v3  ;;  %v50_v14 = vld [vmem:[%s1410_s0 + $0x118] sm:$0xff]  ;;  %v19_v15 = vld [vmem:[%s1410_s0 + $0x20] sm:$0xff]  ;;  %v20_v17 = vld [vmem:[%s1410_s0 + $0x28] sm:$0xff] }
   0x6   :  { %999 = vmatprep.subr.bf16.mxu0 %v998_v6  ;;  %1003 = vmatprep.subr.bf16.mxu1 %v998_v6  ;;  %v51_v16 = vld [vmem:[%s1410_s0 + $0x120] sm:$0xff]  ;;  %v52_v18 = vld [vmem:[%s1410_s0 + $0x128] sm:$0xff]  ;;  %v21_v19 = vld [vmem:[%s1410_s0 + $0x30] sm:$0xff] }
   0x7   :  { %946 = vmatprep.mubr.msk.f32.mxu1 %vm91_vm0, %v47_v7  ;;  %v53_v20 = vld [vmem:[%s1410_s0 + $0x130] sm:$0xff]  ;;  %v22_v21 = vld [vmem:[%s1410_s0 + $0x38] sm:$0xff]  ;;  %v23_v23 = vld [vmem:[%s1410_s0 + $0x40] sm:$0xff] }
   0x8   :  { %v54_v22 = vld [vmem:[%s1410_s0 + $0x138] sm:$0xff]  ;;  %v55_v24 = vld [vmem:[%s1410_s0 + $0x140] sm:$0xff] }
   0x9   :  { %1001 = vmatpush3.bf16.msra.mxu0 %v998_v6  ;;  %1006 = vmatpush3.bf16.msra.mxu1 %v998_v6 }
   0xa   :  { %896 = vmatprep.subr.msk.mxu0 %vm284_vm1, %v83_v8  ;;  %1004 = vmatprep.subr.msk.mxu1 %vm284_vm1, %v83_v8 }
   0xd   :  { %897 = vmatpush3.msk.msra.mxu0 %vm284_vm1, %v83_v8  ;;  %1007 = vmatpush3.msk.msra.mxu1 %vm284_vm1, %v83_v8 }
   0xe   :  { %899 = vmatmul.mubr.msk.f32.vlgmr.msra.gmra.mrb[0].mxu0 %vm91_vm0, %v16_v9  ;;  %947 = vmatmul.mubr.msk.f32.vlgmr.msra.gmra.mrb[0].mxu1 %vm91_vm0, %v48_v10 }
   0xf   :  { %901 = vmatprep.mubr.msk.f32.mxu0 %vm91_vm0, %v17_v11  ;;  %949 = vmatprep.mubr.msk.f32.mxu1 %vm91_vm0, %v49_v12 }
  0x12   :  { %902 = vmatmul.mubr.msk.f32.gmra.mrb[2].mxu0 %vm91_vm0, %v18_v13  ;;  %950 = vmatmul.mubr.msk.f32.gmra.mrb[2].mxu1 %vm91_vm0, %v50_v14 }
  0x13   :  { %904 = vmatprep.mubr.msk.f32.mxu0 %vm91_vm0, %v19_v15  ;;  %952 = vmatprep.mubr.msk.f32.mxu1 %vm91_vm0, %v51_v16 }
  0x16   :  { %905 = vmatmul.mubr.msk.f32.gmra.mrb[4].mxu0 %vm91_vm0, %v20_v17  ;;  %953 = vmatmul.mubr.msk.f32.gmra.mrb[4].mxu1 %vm91_vm0, %v52_v18 }
  0x17   :  { %907 = vmatprep.mubr.msk.f32.mxu0 %vm91_vm0, %v21_v19  ;;  %955 = vmatprep.mubr.msk.f32.mxu1 %vm91_vm0, %v53_v20 }
  0x18   :  { %8 = vsyncpa [#allocation3], 0  ;;  %v24_v25 = vld [vmem:[%s1410_s0 + $0x48] sm:$0xff]  ;;  %v25_v27 = vld [vmem:[%s1410_s0 + $0x50] sm:$0xff] }
  0x19   :  { %v56_v26 = vld [vmem:[%s1410_s0 + $0x148] sm:$0xff]  ;;  %v57_v28 = vld [vmem:[%s1410_s0 + $0x150] sm:$0xff]  ;;  %v26_v29 = vld [vmem:[%s1410_s0 + $0x58] sm:$0xff] }
  0x1a   :  { %908 = vmatmul.mubr.msk.f32.gmra.mrb[6].mxu0 %vm91_vm0, %v22_v21  ;;  %956 = vmatmul.mubr.msk.f32.gmra.mrb[6].mxu1 %vm91_vm0, %v54_v22  ;;  %v58_v30 = vld [vmem:[%s1410_s0 + $0x158] sm:$0xff]  ;;  %v27_v31 = vld [vmem:[%s1410_s0 + $0x60] sm:$0xff]  ;;  %v28_v33 = vld [vmem:[%s1410_s0 + $0x68] sm:$0xff] }
  0x1b   :  { %910 = vmatprep.mubr.msk.f32.mxu0 %vm91_vm0, %v23_v23  ;;  %958 = vmatprep.mubr.msk.f32.mxu1 %vm91_vm0, %v55_v24  ;;  %v59_v32 = vld [vmem:[%s1410_s0 + $0x160] sm:$0xff]  ;;  %v60_v34 = vld [vmem:[%s1410_s0 + $0x168] sm:$0xff]  ;;  %v29_v35 = vld [vmem:[%s1410_s0 + $0x70] sm:$0xff] }
  0x1c   :  { %v61_v36 = vld [vmem:[%s1410_s0 + $0x170] sm:$0xff]  ;;  %v30_v37 = vld [vmem:[%s1410_s0 + $0x78] sm:$0xff]  ;;  %v31_v39 = vld [vmem:[%s1410_s0 + $0x80] sm:$0xff] }
  0x1d   :  { %v62_v38 = vld [vmem:[%s1410_s0 + $0x178] sm:$0xff]  ;;  %v63_v40 = vld [vmem:[%s1410_s0 + $0x180] sm:$0xff]  ;;  %v32_v41 = vld [vmem:[%s1410_s0 + $0x88] sm:$0xff] }
  0x1e   :  { %911 = vmatmul.mubr.msk.f32.gmra.mrb[8].mxu0 %vm91_vm0, %v24_v25  ;;  %959 = vmatmul.mubr.msk.f32.gmra.mrb[8].mxu1 %vm91_vm0, %v56_v26  ;;  %v64_v42 = vld [vmem:[%s1410_s0 + $0x188] sm:$0xff]  ;;  %v33_v43 = vld [vmem:[%s1410_s0 + $0x90] sm:$0xff]  ;;  %v34_v45 = vld [vmem:[%s1410_s0 + $0x98] sm:$0xff] }
  0x1f   :  { %913 = vmatprep.mubr.msk.f32.mxu0 %vm91_vm0, %v25_v27  ;;  %961 = vmatprep.mubr.msk.f32.mxu1 %vm91_vm0, %v57_v28  ;;  %v65_v44 = vld [vmem:[%s1410_s0 + $0x190] sm:$0xff]  ;;  %v66_v46 = vld [vmem:[%s1410_s0 + $0x198] sm:$0xff]  ;;  %v35_v47 = vld [vmem:[%s1410_s0 + $0xa0] sm:$0xff] }
  0x20   :  { %v67_v48 = vld [vmem:[%s1410_s0 + $0x1a0] sm:$0xff]  ;;  %v36_v49 = vld [vmem:[%s1410_s0 + $0xa8] sm:$0xff]  ;;  %v37_v51 = vld [vmem:[%s1410_s0 + $0xb0] sm:$0xff] }
  0x21   :  { %v68_v50 = vld [vmem:[%s1410_s0 + $0x1a8] sm:$0xff]  ;;  %v69_v52 = vld [vmem:[%s1410_s0 + $0x1b0] sm:$0xff]  ;;  %v38_v53 = vld [vmem:[%s1410_s0 + $0xb8] sm:$0xff] }
  0x22   :  { %914 = vmatmul.mubr.msk.f32.gmra.mrb[10].mxu0 %vm91_vm0, %v26_v29  ;;  %962 = vmatmul.mubr.msk.f32.gmra.mrb[10].mxu1 %vm91_vm0, %v58_v30  ;;  %v70_v54 = vld [vmem:[%s1410_s0 + $0x1b8] sm:$0xff]  ;;  %v39_v55 = vld [vmem:[%s1410_s0 + $0xc0] sm:$0xff]  ;;  %v40_v57 = vld [vmem:[%s1410_s0 + $0xc8] sm:$0xff] }
  0x23   :  { %916 = vmatprep.mubr.msk.f32.mxu0 %vm91_vm0, %v27_v31  ;;  %964 = vmatprep.mubr.msk.f32.mxu1 %vm91_vm0, %v59_v32  ;;  %v71_v56 = vld [vmem:[%s1410_s0 + $0x1c0] sm:$0xff]  ;;  %v72_v58 = vld [vmem:[%s1410_s0 + $0x1c8] sm:$0xff]  ;;  %v41_v59 = vld [vmem:[%s1410_s0 + $0xd0] sm:$0xff] }
  0x24   :  { %v73_v60 = vld [vmem:[%s1410_s0 + $0x1d0] sm:$0xff]  ;;  %v42_v61 = vld [vmem:[%s1410_s0 + $0xd8] sm:$0xff]  ;;  %v43_v63 = vld [vmem:[%s1410_s0 + $0xe0] sm:$0xff] }
  0x25   :  { %v74_v62 = vld [vmem:[%s1410_s0 + $0x1d8] sm:$0xff]  ;;  %v75_v0 = vld [vmem:[%s1410_s0 + $0x1e0] sm:$0xff]  ;;  %v44_v1 = vld [vmem:[%s1410_s0 + $0xe8] sm:$0xff] }
  0x26   :  { %917 = vmatmul.mubr.msk.f32.gmra.mrb[12].mxu0 %vm91_vm0, %v28_v33  ;;  %965 = vmatmul.mubr.msk.f32.gmra.mrb[12].mxu1 %vm91_vm0, %v60_v34  ;;  %v76_v2 = vld [vmem:[%s1410_s0 + $0x1e8] sm:$0xff]  ;;  %v45_v3 = vld [vmem:[%s1410_s0 + $0xf0] sm:$0xff]  ;;  %v46_v5 = vld [vmem:[%s1410_s0 + $0xf8] sm:$0xff] }
  0x27   :  { %919 = vmatprep.mubr.msk.f32.mxu0 %vm91_vm0, %v29_v35  ;;  %967 = vmatprep.mubr.msk.f32.mxu1 %vm91_vm0, %v61_v36  ;;  %v77_v4 = vld [vmem:[%s1410_s0 + $0x1f0] sm:$0xff]  ;;  %v78_v6 = vld [vmem:[%s1410_s0 + $0x1f8] sm:$0xff]  ;;  %v1332_v7 = vld [vmem:[%s1412_s2] ss:$0 sm:$0xff]  ;;  %s1035_s0 = smov [#allocation2]  }
  0x28   :  { %s742_s2 = sshll.u32 %s1035_s0, 4  ;;  %s743_s2 = int_to_ptr.vmem [resolvable:$true] %s742_s2 }
  0x29   :  { %s1011_s12 = scalar_lea.vmem %s743_s2, 8192  ;;  %p1016_p1 = scmp.lt.s32.totalorder %s743_s2, %s743_s2 }
  0x2a   :  { %920 = vmatmul.mubr.msk.f32.gmra.mrb[14].mxu0 %vm91_vm0, %v30_v37  ;;  %968 = vmatmul.mubr.msk.f32.gmra.mrb[14].mxu1 %vm91_vm0, %v62_v38  ;;  %p1012_p0 = scmp.ne.s32.totalorder %s743_s2, %s1011_s12  ;;  %p1017_p2 = scmp.lt.s32.totalorder %s1011_s12, %s1011_s12 }
  0x2b   :  { %922 = vmatprep.mubr.msk.f32.mxu0 %vm91_vm0, %v31_v39  ;;  %970 = vmatprep.mubr.msk.f32.mxu1 %vm91_vm0, %v63_v40 }
  0x2c   :  { %p1018_p3 = por %p1017_p2, %p1016_p1 }
  0x2e   :  { %923 = vmatmul.mubr.msk.f32.gmra.mrb[16].mxu0 %vm91_vm0, %v32_v41  ;;  %971 = vmatmul.mubr.msk.f32.gmra.mrb[16].mxu1 %vm91_vm0, %v64_v42  ;;  %p1019_p4 = pnand %p1018_p3, %p1012_p0 }
  0x2f   :  { %925 = vmatprep.mubr.msk.f32.mxu0 %vm91_vm0, %v33_v43  ;;  %973 = vmatprep.mubr.msk.f32.mxu1 %vm91_vm0, %v65_v44 }
  0x32   :  { %926 = vmatmul.mubr.msk.f32.gmra.mrb[18].mxu0 %vm91_vm0, %v34_v45  ;;  %974 = vmatmul.mubr.msk.f32.gmra.mrb[18].mxu1 %vm91_vm0, %v66_v46 }
  0x33   :  { %928 = vmatprep.mubr.msk.f32.mxu0 %vm91_vm0, %v35_v47  ;;  %976 = vmatprep.mubr.msk.f32.mxu1 %vm91_vm0, %v67_v48 }
  0x36   :  { %929 = vmatmul.mubr.msk.f32.gmra.mrb[20].mxu0 %vm91_vm0, %v36_v49  ;;  %977 = vmatmul.mubr.msk.f32.gmra.mrb[20].mxu1 %vm91_vm0, %v68_v50 }
  0x37   :  { %931 = vmatprep.mubr.msk.f32.mxu0 %vm91_vm0, %v37_v51  ;;  %979 = vmatprep.mubr.msk.f32.mxu1 %vm91_vm0, %v69_v52 }
  0x3a   :  { %932 = vmatmul.mubr.msk.f32.gmra.mrb[22].mxu0 %vm91_vm0, %v38_v53  ;;  %980 = vmatmul.mubr.msk.f32.gmra.mrb[22].mxu1 %vm91_vm0, %v70_v54 }
  0x3b   :  { %934 = vmatprep.mubr.msk.f32.mxu0 %vm91_vm0, %v39_v55  ;;  %982 = vmatprep.mubr.msk.f32.mxu1 %vm91_vm0, %v71_v56 }
  0x3e   :  { %935 = vmatmul.mubr.msk.f32.gmra.mrb[24].mxu0 %vm91_vm0, %v40_v57  ;;  %983 = vmatmul.mubr.msk.f32.gmra.mrb[24].mxu1 %vm91_vm0, %v72_v58 }
  0x3f   :  { %937 = vmatprep.mubr.msk.f32.mxu0 %vm91_vm0, %v41_v59  ;;  %985 = vmatprep.mubr.msk.f32.mxu1 %vm91_vm0, %v73_v60 }
  0x42   :  { %938 = vmatmul.mubr.msk.f32.gmra.mrb[26].mxu0 %vm91_vm0, %v42_v61  ;;  %986 = vmatmul.mubr.msk.f32.gmra.mrb[26].mxu1 %vm91_vm0, %v74_v62 }
  0x43   :  { %940 = vmatprep.mubr.msk.f32.mxu0 %vm91_vm0, %v43_v63  ;;  %988 = vmatprep.mubr.msk.f32.mxu1 %vm91_vm0, %v75_v0 }
  0x46   :  { %941 = vmatmul.mubr.msk.f32.gmra.mrb[28].mxu0 %vm91_vm0, %v44_v1  ;;  %989 = vmatmul.mubr.msk.f32.gmra.mrb[28].mxu1 %vm91_vm0, %v76_v2 }
  0x47   :  { %943 = vmatprep.mubr.msk.f32.mxu0 %vm91_vm0, %v45_v3  ;;  %991 = vmatprep.mubr.msk.f32.mxu1 %vm91_vm0, %v77_v4 }
  0x4a   :  { %944 = vmatmul.mubr.msk.f32.gmra.mrb[30].mxu0 %vm91_vm0, %v46_v5  ;;  %992 = vmatmul.mubr.msk.f32.gmra.mrb[30].mxu1 %vm91_vm0, %v78_v6 }
  0xe1   :  { %v900_v8 = vpop.f32.mrb[0].mxu0  ;;  %v948_v9 = vpop.f32.mrb[0].mxu1 }
  0xe2   :  { %v360_v10 = vadd.f32 %v900_v8, %v1332_v7  ;;  %v520_v11 = vadd.f32 %v948_v9, %v1332_v7  ;;  %v354_v12 = vpop.f32.mrb[1].mxu0  ;;  %v514_v13 = vpop.f32.mrb[1].mxu1 }
  0xe3   :  { %v355_v14 = vadd.f32 %v1332_v7, %v354_v12  ;;  %v515_v15 = vadd.f32 %v1332_v7, %v514_v13 }
  0xe4   :  { %674 = vst [vmem:[#allocation2 + $0x8] sm:$0xff] %v360_v10  ;;  %706 = vst [vmem:[#allocation2 + $0x108] sm:$0xff] %v520_v11 }
  0xe5   :  { %673 = vst [vmem:[#allocation2] sm:$0xff] %v355_v14  ;;  %705 = vst [vmem:[#allocation2 + $0x100] sm:$0xff] %v515_v15  ;;  %v903_v16 = vpop.f32.mrb[2].mxu0  ;;  %v951_v17 = vpop.f32.mrb[2].mxu1 }
  0xe6   :  { %v370_v18 = vadd.f32 %v903_v16, %v1332_v7  ;;  %v530_v19 = vadd.f32 %v951_v17, %v1332_v7  ;;  %v364_v20 = vpop.f32.mrb[3].mxu0  ;;  %v524_v21 = vpop.f32.mrb[3].mxu1 }
  0xe7   :  { %v365_v22 = vadd.f32 %v1332_v7, %v364_v20  ;;  %v525_v23 = vadd.f32 %v1332_v7, %v524_v21 }
  0xe8   :  { %676 = vst [vmem:[#allocation2 + $0x18] sm:$0xff] %v370_v18  ;;  %708 = vst [vmem:[#allocation2 + $0x118] sm:$0xff] %v530_v19 }
  0xe9   :  { %675 = vst [vmem:[#allocation2 + $0x10] sm:$0xff] %v365_v22  ;;  %707 = vst [vmem:[#allocation2 + $0x110] sm:$0xff] %v525_v23  ;;  %v906_v24 = vpop.f32.mrb[4].mxu0  ;;  %v954_v25 = vpop.f32.mrb[4].mxu1 }
  0xea   :  { %v380_v26 = vadd.f32 %v906_v24, %v1332_v7  ;;  %v540_v27 = vadd.f32 %v954_v25, %v1332_v7  ;;  %v374_v28 = vpop.f32.mrb[5].mxu0  ;;  %v534_v29 = vpop.f32.mrb[5].mxu1 }
  0xeb   :  { %v375_v30 = vadd.f32 %v1332_v7, %v374_v28  ;;  %v535_v31 = vadd.f32 %v1332_v7, %v534_v29 }
  0xec   :  { %678 = vst [vmem:[#allocation2 + $0x28] sm:$0xff] %v380_v26  ;;  %710 = vst [vmem:[#allocation2 + $0x128] sm:$0xff] %v540_v27 }
  0xed   :  { %677 = vst [vmem:[#allocation2 + $0x20] sm:$0xff] %v375_v30  ;;  %709 = vst [vmem:[#allocation2 + $0x120] sm:$0xff] %v535_v31  ;;  %v909_v32 = vpop.f32.mrb[6].mxu0  ;;  %v957_v33 = vpop.f32.mrb[6].mxu1 }
  0xee   :  { %v390_v34 = vadd.f32 %v909_v32, %v1332_v7  ;;  %v550_v35 = vadd.f32 %v957_v33, %v1332_v7  ;;  %v384_v36 = vpop.f32.mrb[7].mxu0  ;;  %v544_v37 = vpop.f32.mrb[7].mxu1 }
  0xef   :  { %v385_v38 = vadd.f32 %v1332_v7, %v384_v36  ;;  %v545_v39 = vadd.f32 %v1332_v7, %v544_v37 }
  0xf0   :  { %680 = vst [vmem:[#allocation2 + $0x38] sm:$0xff] %v390_v34  ;;  %712 = vst [vmem:[#allocation2 + $0x138] sm:$0xff] %v550_v35 }
  0xf1   :  { %679 = vst [vmem:[#allocation2 + $0x30] sm:$0xff] %v385_v38  ;;  %711 = vst [vmem:[#allocation2 + $0x130] sm:$0xff] %v545_v39  ;;  %v912_v40 = vpop.f32.mrb[8].mxu0  ;;  %v960_v41 = vpop.f32.mrb[8].mxu1 }
  0xf2   :  { %v400_v42 = vadd.f32 %v912_v40, %v1332_v7  ;;  %v560_v43 = vadd.f32 %v960_v41, %v1332_v7  ;;  %v394_v44 = vpop.f32.mrb[9].mxu0  ;;  %v554_v45 = vpop.f32.mrb[9].mxu1 }
  0xf3   :  { %v395_v46 = vadd.f32 %v1332_v7, %v394_v44  ;;  %v555_v47 = vadd.f32 %v1332_v7, %v554_v45 }
  0xf4   :  { %682 = vst [vmem:[#allocation2 + $0x48] sm:$0xff] %v400_v42  ;;  %714 = vst [vmem:[#allocation2 + $0x148] sm:$0xff] %v560_v43 }
  0xf5   :  { %681 = vst [vmem:[#allocation2 + $0x40] sm:$0xff] %v395_v46  ;;  %713 = vst [vmem:[#allocation2 + $0x140] sm:$0xff] %v555_v47  ;;  %v915_v48 = vpop.f32.mrb[10].mxu0  ;;  %v963_v49 = vpop.f32.mrb[10].mxu1 }
  0xf6   :  { %v410_v50 = vadd.f32 %v915_v48, %v1332_v7  ;;  %v570_v51 = vadd.f32 %v963_v49, %v1332_v7  ;;  %v404_v52 = vpop.f32.mrb[11].mxu0  ;;  %v564_v53 = vpop.f32.mrb[11].mxu1 }
  0xf7   :  { %v405_v54 = vadd.f32 %v1332_v7, %v404_v52  ;;  %v565_v55 = vadd.f32 %v1332_v7, %v564_v53 }
  0xf8   :  { %684 = vst [vmem:[#allocation2 + $0x58] sm:$0xff] %v410_v50  ;;  %716 = vst [vmem:[#allocation2 + $0x158] sm:$0xff] %v570_v51 }
  0xf9   :  { %683 = vst [vmem:[#allocation2 + $0x50] sm:$0xff] %v405_v54  ;;  %715 = vst [vmem:[#allocation2 + $0x150] sm:$0xff] %v565_v55  ;;  %v918_v56 = vpop.f32.mrb[12].mxu0  ;;  %v966_v57 = vpop.f32.mrb[12].mxu1 }
  0xfa   :  { %v420_v58 = vadd.f32 %v918_v56, %v1332_v7  ;;  %v580_v59 = vadd.f32 %v966_v57, %v1332_v7  ;;  %v414_v60 = vpop.f32.mrb[13].mxu0  ;;  %v574_v61 = vpop.f32.mrb[13].mxu1 }
  0xfb   :  { %v415_v62 = vadd.f32 %v1332_v7, %v414_v60  ;;  %v575_v63 = vadd.f32 %v1332_v7, %v574_v61 }
  0xfc   :  { %686 = vst [vmem:[#allocation2 + $0x68] sm:$0xff] %v420_v58  ;;  %718 = vst [vmem:[#allocation2 + $0x168] sm:$0xff] %v580_v59 }
  0xfd   :  { %685 = vst [vmem:[#allocation2 + $0x60] sm:$0xff] %v415_v62  ;;  %717 = vst [vmem:[#allocation2 + $0x160] sm:$0xff] %v575_v63  ;;  %v921_v0 = vpop.f32.mrb[14].mxu0  ;;  %v969_v1 = vpop.f32.mrb[14].mxu1 }
  0xfe   :  { %v430_v2 = vadd.f32 %v921_v0, %v1332_v7  ;;  %v590_v3 = vadd.f32 %v969_v1, %v1332_v7  ;;  %v424_v4 = vpop.f32.mrb[15].mxu0  ;;  %v584_v5 = vpop.f32.mrb[15].mxu1 }
  0xff   :  { %v425_v6 = vadd.f32 %v1332_v7, %v424_v4  ;;  %v585_v8 = vadd.f32 %v1332_v7, %v584_v5 }
 0x100   :  { %688 = vst [vmem:[#allocation2 + $0x78] sm:$0xff] %v430_v2  ;;  %720 = vst [vmem:[#allocation2 + $0x178] sm:$0xff] %v590_v3 }
 0x101   :  { %687 = vst [vmem:[#allocation2 + $0x70] sm:$0xff] %v425_v6  ;;  %719 = vst [vmem:[#allocation2 + $0x170] sm:$0xff] %v585_v8  ;;  %v924_v9 = vpop.f32.mrb[16].mxu0  ;;  %v972_v10 = vpop.f32.mrb[16].mxu1 }
 0x102   :  { %v440_v11 = vadd.f32 %v924_v9, %v1332_v7  ;;  %v600_v12 = vadd.f32 %v972_v10, %v1332_v7  ;;  %v434_v13 = vpop.f32.mrb[17].mxu0  ;;  %v594_v14 = vpop.f32.mrb[17].mxu1 }
 0x103   :  { %v435_v15 = vadd.f32 %v1332_v7, %v434_v13  ;;  %v595_v16 = vadd.f32 %v1332_v7, %v594_v14 }
 0x104   :  { %690 = vst [vmem:[#allocation2 + $0x88] sm:$0xff] %v440_v11  ;;  %722 = vst [vmem:[#allocation2 + $0x188] sm:$0xff] %v600_v12 }
 0x105   :  { %689 = vst [vmem:[#allocation2 + $0x80] sm:$0xff] %v435_v15  ;;  %721 = vst [vmem:[#allocation2 + $0x180] sm:$0xff] %v595_v16  ;;  %v927_v17 = vpop.f32.mrb[18].mxu0  ;;  %v975_v18 = vpop.f32.mrb[18].mxu1 }
 0x106   :  { %v450_v19 = vadd.f32 %v927_v17, %v1332_v7  ;;  %v610_v20 = vadd.f32 %v975_v18, %v1332_v7  ;;  %v444_v21 = vpop.f32.mrb[19].mxu0  ;;  %v604_v22 = vpop.f32.mrb[19].mxu1 }
 0x107   :  { %v445_v23 = vadd.f32 %v1332_v7, %v444_v21  ;;  %v605_v24 = vadd.f32 %v1332_v7, %v604_v22 }
 0x108   :  { %692 = vst [vmem:[#allocation2 + $0x98] sm:$0xff] %v450_v19  ;;  %724 = vst [vmem:[#allocation2 + $0x198] sm:$0xff] %v610_v20 }
 0x109   :  { %691 = vst [vmem:[#allocation2 + $0x90] sm:$0xff] %v445_v23  ;;  %723 = vst [vmem:[#allocation2 + $0x190] sm:$0xff] %v605_v24  ;;  %v930_v25 = vpop.f32.mrb[20].mxu0  ;;  %v978_v26 = vpop.f32.mrb[20].mxu1 }
 0x10a   :  { %v460_v27 = vadd.f32 %v930_v25, %v1332_v7  ;;  %v620_v28 = vadd.f32 %v978_v26, %v1332_v7  ;;  %v454_v29 = vpop.f32.mrb[21].mxu0  ;;  %v614_v30 = vpop.f32.mrb[21].mxu1 }
 0x10b   :  { %v455_v31 = vadd.f32 %v1332_v7, %v454_v29  ;;  %v615_v32 = vadd.f32 %v1332_v7, %v614_v30 }
 0x10c   :  { %694 = vst [vmem:[#allocation2 + $0xa8] sm:$0xff] %v460_v27  ;;  %726 = vst [vmem:[#allocation2 + $0x1a8] sm:$0xff] %v620_v28 }
 0x10d   :  { %693 = vst [vmem:[#allocation2 + $0xa0] sm:$0xff] %v455_v31  ;;  %725 = vst [vmem:[#allocation2 + $0x1a0] sm:$0xff] %v615_v32  ;;  %v933_v33 = vpop.f32.mrb[22].mxu0  ;;  %v981_v34 = vpop.f32.mrb[22].mxu1 }
 0x10e   :  { %v470_v35 = vadd.f32 %v933_v33, %v1332_v7  ;;  %v630_v36 = vadd.f32 %v981_v34, %v1332_v7  ;;  %v464_v37 = vpop.f32.mrb[23].mxu0  ;;  %v624_v38 = vpop.f32.mrb[23].mxu1 }
 0x10f   :  { %v465_v39 = vadd.f32 %v1332_v7, %v464_v37  ;;  %v625_v40 = vadd.f32 %v1332_v7, %v624_v38 }
 0x110   :  { %696 = vst [vmem:[#allocation2 + $0xb8] sm:$0xff] %v470_v35  ;;  %728 = vst [vmem:[#allocation2 + $0x1b8] sm:$0xff] %v630_v36 }
 0x111   :  { %695 = vst [vmem:[#allocation2 + $0xb0] sm:$0xff] %v465_v39  ;;  %727 = vst [vmem:[#allocation2 + $0x1b0] sm:$0xff] %v625_v40  ;;  %v936_v41 = vpop.f32.mrb[24].mxu0  ;;  %v984_v42 = vpop.f32.mrb[24].mxu1 }
 0x112   :  { %v480_v43 = vadd.f32 %v936_v41, %v1332_v7  ;;  %v640_v44 = vadd.f32 %v984_v42, %v1332_v7  ;;  %v474_v45 = vpop.f32.mrb[25].mxu0  ;;  %v634_v46 = vpop.f32.mrb[25].mxu1 }
 0x113   :  { %v475_v47 = vadd.f32 %v1332_v7, %v474_v45  ;;  %v635_v48 = vadd.f32 %v1332_v7, %v634_v46 }
 0x114   :  { %698 = vst [vmem:[#allocation2 + $0xc8] sm:$0xff] %v480_v43  ;;  %730 = vst [vmem:[#allocation2 + $0x1c8] sm:$0xff] %v640_v44 }
 0x115   :  { %697 = vst [vmem:[#allocation2 + $0xc0] sm:$0xff] %v475_v47  ;;  %729 = vst [vmem:[#allocation2 + $0x1c0] sm:$0xff] %v635_v48  ;;  %v939_v49 = vpop.f32.mrb[26].mxu0  ;;  %v987_v50 = vpop.f32.mrb[26].mxu1 }
 0x116   :  { %v490_v51 = vadd.f32 %v939_v49, %v1332_v7  ;;  %v650_v52 = vadd.f32 %v987_v50, %v1332_v7  ;;  %v484_v53 = vpop.f32.mrb[27].mxu0  ;;  %v644_v54 = vpop.f32.mrb[27].mxu1 }
 0x117   :  { %v485_v55 = vadd.f32 %v1332_v7, %v484_v53  ;;  %v645_v56 = vadd.f32 %v1332_v7, %v644_v54 }
 0x118   :  { %700 = vst [vmem:[#allocation2 + $0xd8] sm:$0xff] %v490_v51  ;;  %732 = vst [vmem:[#allocation2 + $0x1d8] sm:$0xff] %v650_v52 }
 0x119   :  { %699 = vst [vmem:[#allocation2 + $0xd0] sm:$0xff] %v485_v55  ;;  %731 = vst [vmem:[#allocation2 + $0x1d0] sm:$0xff] %v645_v56  ;;  %v942_v57 = vpop.f32.mrb[28].mxu0  ;;  %v990_v58 = vpop.f32.mrb[28].mxu1 }
 0x11a   :  { %v500_v59 = vadd.f32 %v942_v57, %v1332_v7  ;;  %v660_v60 = vadd.f32 %v990_v58, %v1332_v7  ;;  %v494_v61 = vpop.f32.mrb[29].mxu0  ;;  %v654_v62 = vpop.f32.mrb[29].mxu1 }
 0x11b   :  { %v495_v63 = vadd.f32 %v1332_v7, %v494_v61  ;;  %v655_v0 = vadd.f32 %v1332_v7, %v654_v62 }
 0x11c   :  { %702 = vst [vmem:[#allocation2 + $0xe8] sm:$0xff] %v500_v59  ;;  %734 = vst [vmem:[#allocation2 + $0x1e8] sm:$0xff] %v660_v60 }
 0x11d   :  { %701 = vst [vmem:[#allocation2 + $0xe0] sm:$0xff] %v495_v63  ;;  %733 = vst [vmem:[#allocation2 + $0x1e0] sm:$0xff] %v655_v0  ;;  %v945_v1 = vpop.f32.mrb[30].mxu0  ;;  %v993_v2 = vpop.f32.mrb[30].mxu1 }
 0x11e   :  { %v510_v3 = vadd.f32 %v945_v1, %v1332_v7  ;;  %v670_v4 = vadd.f32 %v993_v2, %v1332_v7  ;;  %v504_v5 = vpop.f32.mrb[31].mxu0  ;;  %v664_v6 = vpop.f32.mrb[31].mxu1 }
 0x11f   :  { %v505_v8 = vadd.f32 %v1332_v7, %v504_v5  ;;  %v665_v9 = vadd.f32 %v1332_v7, %v664_v6 }
 0x120   :  { %704 = vst [vmem:[#allocation2 + $0xf8] sm:$0xff] %v510_v3  ;;  %736 = vst [vmem:[#allocation2 + $0x1f8] sm:$0xff] %v670_v4 }
 0x121   :  { %703 = vst [vmem:[#allocation2 + $0xf0] sm:$0xff] %v505_v8  ;;  %735 = vst [vmem:[#allocation2 + $0x1f0] sm:$0xff] %v665_v9 }
 0x122   :  { %1022 = shalt.err (!%p1019_p4)
}
 0x123   :  { %s1023_s15 = scalar_lea.hbm %s1413_s3, 8192 }
 0x124   :  { %p1024_p5 = scmp.ne.s32.totalorder %s1413_s3, %s1023_s15  ;;  %p1027_p6 = scmp.lt.u32.totalorder %s1023_s15, %s1413_s3 }
 0x126   :  { %p1029_p7 = pnand %p1027_p6, %p1024_p5 }
 0x128   :  { %1032 = shalt.err (!%p1029_p7)
}
 0x129   :  { %s1036_s20 = smov 128   ;;  %s1037_s21 = smov 8  }
 0x12a   :  { %748 = dma.vmem_to_hbm [thread:$0]  %s743_s2, 8192, %s1413_s3, [#allocation3], %s1036_s20, %s1036_s20, %s1037_s21  }
 0x12b   :  { %1033 = dma.done.wait [#allocation3], 8192  }
 0x12c   :  { %1034 = vsyncadd [#allocation3], 4294959104 }
 0x12d   :  { %752 = vsyncpa [#allocation3], 1 }

</bundles_post_ra>
